<compile_context>
chip_gen: v5e
topology: v5e:2x2
jax: 0.10.0
libtpu: 0.0.40
codegen_flags: <defaults>
</compile_context>

<pallas_src>
import jax
import jax.numpy as jnp
import numpy as np
from jax.experimental import pallas as pl
from jax.experimental.pallas import tpu as pltpu

KSIZE = 5   # kernel_size in the module
PAD = 2     # padding in the module ("same" for k=5)


def conv_relu_kernel(x_ref, wbig_ref, bbig_ref, o_ref, xp_ref):
    # x_ref:    (B, T, F)         VMEM  input (pre-unsqueeze PyTorch layout)
    # wbig_ref: (K*F, F*C)        VMEM  block-Toeplitz repacked conv weight, bf16
    # bbig_ref: (1, F*C)          VMEM  bias tiled per feature column, f32
    # o_ref:    (B, T, F*C)       VMEM  output, final channel-last layout
    # xp_ref:   (B, T+2*PAD, F)   VMEM  scratch: time-padded copy of the input
    B, T, F = x_ref.shape
    K = KSIZE
    FC = o_ref.shape[-1]

    # In-kernel zero padding along the time axis (no jnp.pad HBM round trip).
    xp_ref[...] = jnp.zeros_like(xp_ref)
    xp_ref[:, PAD:PAD + T, :] = x_ref[...]

    # Row-im2col: K time-shifted row slabs concatenated along lanes
    #   xbig[(b, t), ky*F + fin] = xpad[b, t + ky, fin]
    # Lane-direction (kx) shifts are folded into W_big, so no unaligned lane
    # slices are needed here; the K sublane-offset loads are hoisted (done once,
    # not per output channel).
    xbig = jnp.concatenate([xp_ref[:, ky:ky + T, :] for ky in range(K)], axis=-1)
    xbig = xbig.reshape(B * T, K * F).astype(jnp.bfloat16)

    # Single MXU matmul (bf16 operands, f32 accumulation) -> channel-last output.
    acc = jnp.dot(xbig, wbig_ref[...], preferred_element_type=jnp.float32)
    y = jnp.maximum(acc + bbig_ref[...], 0.0)          # fused bias + ReLU
    o_ref[...] = y.reshape(B, T, FC).astype(o_ref.dtype)


def conv_layer_2d(x, weight, bias):
    """x: (B, T, F) float32; weight: (C, 1, K, K); bias: (C,).  Returns (B, T, F*C)."""
    B, T, F = x.shape
    C = weight.shape[0]
    K = KSIZE

    # One-time weight repacking (tiny, done on the parameters only):
    #   W_big[ky*F + fin, f*C + c] = weight[c, 0, ky, fin - f + PAD]  if |fin - f| <= PAD
    #                                0                                otherwise
    # This folds the kx taps and the feature-axis zero padding into the matmul.
    w2 = weight.reshape(C, K, K).astype(jnp.float32)
    fin = jnp.arange(F)[:, None]                    # (F, 1) input-feature index
    fo = jnp.arange(F)[None, :]                     # (1, F) output-position index
    kx = fin - fo + PAD                             # (F, F) tap index
    valid = (kx >= 0) & (kx < K)
    gathered = w2[:, :, jnp.clip(kx, 0, K - 1)]     # (C, K, F_in, F_out)
    gathered = jnp.where(valid[None, None], gathered, 0.0)
    w_big = jnp.transpose(gathered, (1, 2, 3, 0)).reshape(K * F, F * C)
    w_big = w_big.astype(jnp.bfloat16)              # bf16 MXU operand (f32 accumulation)
    b_big = jnp.tile(bias.astype(jnp.float32), F).reshape(1, F * C)

    # Single grid step: the whole (tiny) problem lives in VMEM at once.
    return pl.pallas_call(
        conv_relu_kernel,
        out_shape=jax.ShapeDtypeStruct((B, T, F * C), jnp.float32),
        in_specs=[
            pl.BlockSpec(memory_space=pltpu.MemorySpace.VMEM),
            pl.BlockSpec(memory_space=pltpu.MemorySpace.VMEM),
            pl.BlockSpec(memory_space=pltpu.MemorySpace.VMEM),
        ],
        out_specs=pl.BlockSpec(memory_space=pltpu.MemorySpace.VMEM),
        scratch_shapes=[pltpu.VMEM((B, T + 2 * PAD, F), jnp.float32)],
    )(x.astype(jnp.float32), w_big, b_big)


if __name__ == "__main__":
    # Small shapes consistent with the module: n_features = F, window_size = T.
    B, T, F = 2, 16, 8
    C = F  # Conv2d out_channels = n_features

    key = jax.random.PRNGKey(0)
    kx_, kw, kb = jax.random.split(key, 3)
    x = jax.random.normal(kx_, (B, T, F), dtype=jnp.float32)

    # Deterministic init mimicking PyTorch Conv2d default uniform bound 1/sqrt(fan_in),
    # fan_in = in_channels * K * K = 25.
    bound = 1.0 / np.sqrt(1 * KSIZE * KSIZE)
    weight = jax.random.uniform(kw, (C, 1, KSIZE, KSIZE), jnp.float32, -bound, bound)
    bias = jax.random.uniform(kb, (C,), jnp.float32, -bound, bound)

    y = jax.block_until_ready(conv_layer_2d(x, weight, bias))

    # Pure-JAX reference of the exact PyTorch forward semantics (full f32 precision).
    ref = jax.lax.conv_general_dilated(
        x[:, None, :, :], weight, (1, 1), ((PAD, PAD), (PAD, PAD)),
        dimension_numbers=("NCHW", "OIHW", "NCHW"),
        precision=jax.lax.Precision.HIGHEST)
    ref = jnp.maximum(ref + bias[None, :, None, None], 0.0)
    ref = jnp.transpose(ref, (0, 2, 3, 1)).reshape(B, T, F * C)

    assert y.shape == (B, T, F * C)
    # Tolerance covers bf16 operand rounding on the MXU (per perf review); the
    # contraction itself accumulates in f32.
    np.testing.assert_allclose(np.asarray(y), np.asarray(ref), rtol=2e-2, atol=2e-2)
    print("KERNEL_OK")
</pallas_src>

<mosaic_0001>
module attributes {stable_mosaic.version = 11 : i64} {
  func.func @conv_relu_kernel(%arg0: memref<2x16x8xf32, #tpu.memory_space<vmem>>, %arg1: memref<40x64xbf16, #tpu.memory_space<vmem>>, %arg2: memref<1x64xf32, #tpu.memory_space<vmem>>, %arg3: memref<2x16x64xf32, #tpu.memory_space<vmem>>, %arg4: memref<2x20x8xf32, #tpu.memory_space<vmem>>) attributes {dimension_semantics = [], scalar_prefetch = 0 : i64, scratch_operands = 1 : i64, tpu.core_type = #tpu.core_type<tc>} {
    %cst = arith.constant 0.000000e+00 : f32
    %0 = vector.broadcast %cst : f32 to vector<2x20x8xf32>
    %c0 = arith.constant 0 : index
    %c0_0 = arith.constant 0 : index
    %c0_1 = arith.constant 0 : index
    %1 = vector.load %arg4[%c0, %c0_0, %c0_1] : memref<2x20x8xf32, #tpu.memory_space<vmem>>, vector<2x20x8xf32>
    tpu.vector_store %arg4[%c0, %c0_0, %c0_1], %0 {strides = array<i32>} : memref<2x20x8xf32, #tpu.memory_space<vmem>>, vector<2x20x8xf32>,
    %c0_2 = arith.constant 0 : index
    %c0_3 = arith.constant 0 : index
    %c0_4 = arith.constant 0 : index
    %2 = vector.load %arg0[%c0_2, %c0_3, %c0_4] : memref<2x16x8xf32, #tpu.memory_space<vmem>>, vector<2x16x8xf32>
    %c0_5 = arith.constant 0 : index
    %c2 = arith.constant 2 : index
    %c0_6 = arith.constant 0 : index
    %3 = vector.load %arg4[%c0_5, %c2, %c0_6] : memref<2x20x8xf32, #tpu.memory_space<vmem>>, vector<2x16x8xf32>
    tpu.vector_store %arg4[%c0_5, %c2, %c0_6], %2 {strides = array<i32>} : memref<2x20x8xf32, #tpu.memory_space<vmem>>, vector<2x16x8xf32>,
    %c0_7 = arith.constant 0 : index
    %c0_8 = arith.constant 0 : index
    %c0_9 = arith.constant 0 : index
    %4 = vector.load %arg4[%c0_7, %c0_8, %c0_9] : memref<2x20x8xf32, #tpu.memory_space<vmem>>, vector<2x16x8xf32>
    %c0_10 = arith.constant 0 : index
    %c1 = arith.constant 1 : index
    %c0_11 = arith.constant 0 : index
    %5 = vector.load %arg4[%c0_10, %c1, %c0_11] : memref<2x20x8xf32, #tpu.memory_space<vmem>>, vector<2x16x8xf32>
    %c0_12 = arith.constant 0 : index
    %c2_13 = arith.constant 2 : index
    %c0_14 = arith.constant 0 : index
    %6 = vector.load %arg4[%c0_12, %c2_13, %c0_14] : memref<2x20x8xf32, #tpu.memory_space<vmem>>, vector<2x16x8xf32>
    %c0_15 = arith.constant 0 : index
    %c3 = arith.constant 3 : index
    %c0_16 = arith.constant 0 : index
    %7 = vector.load %arg4[%c0_15, %c3, %c0_16] : memref<2x20x8xf32, #tpu.memory_space<vmem>>, vector<2x16x8xf32>
    %c0_17 = arith.constant 0 : index
    %c4 = arith.constant 4 : index
    %c0_18 = arith.constant 0 : index
    %8 = vector.load %arg4[%c0_17, %c4, %c0_18] : memref<2x20x8xf32, #tpu.memory_space<vmem>>, vector<2x16x8xf32>
    %9 = tpu.concatenate %4, %5, %6, %7, %8 in 2 : vector<2x16x8xf32>, vector<2x16x8xf32>, vector<2x16x8xf32>, vector<2x16x8xf32>, vector<2x16x8xf32> -> vector<2x16x40xf32>
    %10 = vector.shape_cast %9 : vector<2x16x40xf32> to vector<32x40xf32>
    %11 = arith.truncf %10 : vector<32x40xf32> to vector<32x40xbf16>
    %c0_19 = arith.constant 0 : index
    %c0_20 = arith.constant 0 : index
    %12 = vector.load %arg1[%c0_19, %c0_20] : memref<40x64xbf16, #tpu.memory_space<vmem>>, vector<40x64xbf16>
    %cst_21 = arith.constant dense<0.000000e+00> : vector<32x64xf32>
    %13 = tpu.matmul %11, %12, %cst_21 {dimension_numbers = #tpu.dot_dimension_numbers<[1], [0], [0], [1], [0, 0, 1, 1], [], []>} : vector<32x40xbf16>, vector<40x64xbf16>, vector<32x64xf32> -> vector<32x64xf32>
    %c0_22 = arith.constant 0 : index
    %c0_23 = arith.constant 0 : index
    %14 = vector.load %arg2[%c0_22, %c0_23] : memref<1x64xf32, #tpu.memory_space<vmem>>, vector<1x64xf32>
    %15 = vector.broadcast %14 : vector<1x64xf32> to vector<32x64xf32>
    %16 = arith.addf %13, %15 : vector<32x64xf32>
    %cst_24 = arith.constant 0.000000e+00 : f32
    %17 = vector.broadcast %cst_24 : f32 to vector<32x64xf32>
    %18 = arith.maximumf %16, %17 : vector<32x64xf32>
    %19 = vector.shape_cast %18 : vector<32x64xf32> to vector<2x16x64xf32>
    %c0_25 = arith.constant 0 : index
    %c0_26 = arith.constant 0 : index
    %c0_27 = arith.constant 0 : index
    %20 = vector.load %arg3[%c0_25, %c0_26, %c0_27] : memref<2x16x64xf32, #tpu.memory_space<vmem>>, vector<2x16x64xf32>
    tpu.vector_store %arg3[%c0_25, %c0_26, %c0_27], %19 {strides = array<i32>} : memref<2x16x64xf32, #tpu.memory_space<vmem>>, vector<2x16x64xf32>,
    return
  }
}

</mosaic_0001>

<bundles_post_ra>
// kernel: tpu_custom_call.1
= control target key start
LH: loop header
LB: loop body
LE: loop exit
PB: predicated region body
PF: predicated region fallthrough
CT: control target
= control target key end

     0   :  { %vm16_vm0 = vcmask 64512   ;;  %vm19_vm1 = vcmask 60416   ;;  %v307_v0 = vmov 0.0   ;;  %s390_s0 = inlined_call_operand.vmem [shape: f32[2,16,8], index: 0, kind: input, shape index: {}]   ;;  %s391_s1 = inlined_call_operand.vmem [shape: bf16[40,64], index: 1, kind: input, shape index: {}]   ;;  %s392_s2 = inlined_call_operand.vmem [shape: f32[1,64], index: 2, kind: input, shape index: {}]   ;;  %s393_s3 = inlined_call_operand.hbm [shape: f32[2,16,64], index: 3, kind: output, shape index: {}]  }
   0x1   :  { %17 = vst.msk [vmem:[#allocation2] sm:$0xff] %vm16_vm0, %v307_v0  ;;  %v24_v1 = vld [vmem:[%s390_s0] sm:$0xff] }
   0x2   :  { %18 = vst.msk [vmem:[#allocation2 + $0x8] sm:$0xff] %vm16_vm0, %v307_v0 }
   0x3   :  { %8 = vsyncpa [#allocation4], 0  ;;  %20 = vst.msk [vmem:[#allocation2 + $0x10] sm:$0xf] %vm19_vm1, %v307_v0  ;;  %v25_v2 = vld [vmem:[%s390_s0 + $0x8] sm:$0xff]  ;;  %v26_v3 = vld [vmem:[%s390_s0 + $0x10] sm:$0xff] }
   0x4   :  { %23 = vst.msk [vmem:[#allocation2 + $0x28] sm:$0xf] %vm19_vm1, %v307_v0  ;;  %v27_v4 = vld [vmem:[%s390_s0 + $0x18] sm:$0xff]  ;;  %s308_s20 = smov 16   ;;  %s309_s21 = smov 8   ;;  %vm168_vm2 = vcmask 1043456  }
   0x5   :  { %28 = vst.msk [vmem:[#allocation2 + $0x2] sm:$0xff] %vm16_vm0, %v24_v1  ;;  %s310_s0 = smov 24   ;;  %s311_s22 = smov 32   ;;  %v141_v29 = vld [vmem:[%s391_s1 + $0x10] sm:$0xf]  ;;  %v229_v33 = vld [vmem:[%s391_s1 + $0x8] sm:$0xff] }
   0x6   :  { %29 = vst.msk [vmem:[#allocation2 + $0xa] sm:$0xff] %vm16_vm0, %v25_v2  ;;  %v155_v30 = vunpack.c.l.b16 %v141_v29  ;;  %v228_v34 = vld [vmem:[%s391_s1] sm:$0xff]  ;;  %vm120_vm3 = vcmask 130048   ;;  %vm125_vm4 = vcmask 195584   ;;  %vm130_vm5 = vcmask 261120   ;;  %s312_s30 = smov [#allocation3]  }
   0x7   :  { %21 = vst.msk [vmem:[#allocation2 + $0x18] sm:$0xff] %vm16_vm0, %v307_v0  ;;  %vm161_vm6 = vcmask 326656   ;;  %vm195_vm7 = vcmask 523264   ;;  %s204_s4 = sshll.u32 %s312_s30, 4  ;;  %s313_s7 = smov 128   ;;  %s205_s4 = int_to_ptr.vmem [resolvable:$true] %s204_s4 }
   0x8   :  { %22 = vst.msk [vmem:[#allocation2 + $0x20] sm:$0xff] %vm16_vm0, %v307_v0  ;;  %v158_v31 = vpack.c.b16 %v155_v30, %v155_v30 }
   0x9   :  { %30 = vst.msk [vmem:[#allocation2 + $0x1a] sm:$0xff] %vm16_vm0, %v26_v3 }
   0xa   :  { %31 = vst.msk [vmem:[#allocation2 + $0x22] sm:$0xff] %vm16_vm0, %v27_v4  ;;  %v170_v32 = vsel %vm168_vm2, %v158_v31, 0 }
   0xb   :  { %177 = vmatpush.bf16.msra.mxu0 %v170_v32  ;;  %230 = vmatpush.bf16.msra.mxu1 %v170_v32 }
   0xc   :  { %v40_v5 = vld [vmem:[#allocation2 + $0x2] sm:$0xff] }
   0xd   :  { %v36_v6 = vld [vmem:[#allocation2 + $0x1] sm:$0xff]  ;;  %v41_v7 = vld [vmem:[#allocation2 + $0xa] sm:$0xff] }
   0xe   :  { %v37_v8 = vld [vmem:[#allocation2 + $0x9] sm:$0xff]  ;;  %v250_v9 = vpack.i.bf16 %v41_v7, %v40_v5  ;;  %v32_v40 = vld [vmem:[#allocation2] sm:$0xff] }
   0xf   :  { %v240_v10 = vpack.i.bf16 %v37_v8, %v36_v6  ;;  %v44_v11 = vld [vmem:[#allocation2 + $0x3] sm:$0xff]  ;;  %v45_v12 = vld [vmem:[#allocation2 + $0xb] sm:$0xff]  ;;  %178 = vmatpush.bf16.msra.mxu0 %v229_v33  ;;  %231 = vmatpush.bf16.msra.mxu1 %v229_v33 }
  0x10   :  { %v260_v13 = vpack.i.bf16 %v45_v12, %v44_v11  ;;  %251 = vrot.lane.b32.xlu1 %v250_v9, %s308_s20  ;;  %v42_v14 = vld [vmem:[#allocation2 + $0x1a] sm:$0xff]  ;;  %v48_v23 = vld [vmem:[#allocation2 + $0x4] sm:$0xff]  ;;  %v49_v26 = vld [vmem:[#allocation2 + $0xc] sm:$0xff] }
  0x11   :  { %241 = vrot.lane.b32.xlu0 %v240_v10, %s309_s21  ;;  %v43_v15 = vld [vmem:[#allocation2 + $0x22] sm:$0xff]  ;;  %v38_v16 = vld [vmem:[#allocation2 + $0x19] sm:$0xff]  ;;  %v270_v28 = vpack.i.bf16 %v49_v26, %v48_v23 }
  0x12   :  { %v39_v17 = vld [vmem:[#allocation2 + $0x21] sm:$0xff]  ;;  %261 = vrot.lane.b32.xlu2 %v260_v13, %s310_s0  ;;  %v255_v20 = vpack.i.bf16 %v43_v15, %v42_v14  ;;  %v34_v44 = vld [vmem:[#allocation2 + $0x18] sm:$0xff] }
  0x13   :  { %v46_v18 = vld [vmem:[#allocation2 + $0x1b] sm:$0xff]  ;;  %v47_v19 = vld [vmem:[#allocation2 + $0x23] sm:$0xff]  ;;  %v245_v21 = vpack.i.bf16 %v39_v17, %v38_v16  ;;  %179 = vmatpush.bf16.msra.mxu0 %v228_v34  ;;  %232 = vmatpush.bf16.msra.mxu1 %v228_v34 }
  0x14   :  { %v265_v22 = vpack.i.bf16 %v47_v19, %v46_v18  ;;  %v50_v24 = vld [vmem:[#allocation2 + $0x1c] sm:$0xff]  ;;  %v51_v25 = vld [vmem:[#allocation2 + $0x24] sm:$0xff] }
  0x15   :  { %v275_v27 = vpack.i.bf16 %v51_v25, %v50_v24  ;;  %v33_v43 = vld [vmem:[#allocation2 + $0x8] sm:$0xff]  ;;  %v35_v45 = vld [vmem:[#allocation2 + $0x20] sm:$0xff] }
  0x16   :  { %v280_v17 = vld [vmem:[%s392_s2] ss:$0 sm:$0xff]  ;;  %s206_s2 = sshll.u32 %s393_s3, 4  ;;  %s207_s2 = int_to_ptr.hbm [resolvable:$true] %s206_s2 }
  0x18   :  { %256 = vrot.lane.b32.xlu1 %v255_v20, %s308_s20 }
  0x19   :  { %246 = vrot.lane.b32.xlu0 %v245_v21, %s309_s21 }
  0x1a   :  { %266 = vrot.lane.b32.xlu2 %v265_v22, %s310_s0 }
  0x20   :  { %276 = vrot.lane.b32.xlu1 %v275_v27, %s311_s22 }
  0x21   :  { %271 = vrot.lane.b32.xlu0 %v270_v28, %s311_s22 }
  0x6c   :  { %v262_v37 = vpop.permute.xlu2 %261 }
  0x6d   :  { %v264_v57 = vunpack.i.h.bf16 %v262_v37  ;;  %v263_v58 = vunpack.i.l.bf16 %v262_v37 }
  0x74   :  { %v267_v52 = vpop.permute.xlu2 %266 }
  0x75   :  { %v269_v59 = vunpack.i.h.bf16 %v267_v52  ;;  %v268_v60 = vunpack.i.l.bf16 %v267_v52 }
  0x82   :  { %v252_v35 = vpop.permute.xlu1 %251 }
  0x83   :  { %v242_v36 = vpop.permute.xlu0 %241  ;;  %v254_v48 = vunpack.i.h.bf16 %v252_v35  ;;  %v253_v49 = vunpack.i.l.bf16 %v252_v35 }
  0x84   :  { %v244_v38 = vunpack.i.h.bf16 %v242_v36  ;;  %v243_v39 = vunpack.i.l.bf16 %v242_v36 }
  0x86   :  { %v116_v53 = vsel %vm16_vm0, %v32_v40, %v243_v39  ;;  %v117_v54 = vsel %vm16_vm0, %v33_v43, %v244_v38 }
  0x87   :  { %v121_v61 = vsel %vm120_vm3, %v116_v53, %v253_v49  ;;  %v122_v62 = vsel %vm120_vm3, %v117_v54, %v254_v48 }
  0x88   :  { %v126_v7 = vsel %vm125_vm4, %v121_v61, %v263_v58  ;;  %v127_v8 = vsel %vm125_vm4, %v122_v62, %v264_v57 }
  0x8a   :  { %v257_v41 = vpop.permute.xlu1 %256 }
  0x8b   :  { %v247_v42 = vpop.permute.xlu0 %246  ;;  %v259_v50 = vunpack.i.h.bf16 %v257_v41  ;;  %v258_v51 = vunpack.i.l.bf16 %v257_v41 }
  0x8c   :  { %v249_v46 = vunpack.i.h.bf16 %v247_v42  ;;  %v248_v47 = vunpack.i.l.bf16 %v247_v42 }
  0x8e   :  { %v119_v55 = vsel %vm16_vm0, %v35_v45, %v249_v46  ;;  %v118_v56 = vsel %vm16_vm0, %v34_v44, %v248_v47 }
  0x8f   :  { %v123_v63 = vsel %vm120_vm3, %v118_v56, %v258_v51  ;;  %v124_v0 = vsel %vm120_vm3, %v119_v55, %v259_v50 }
  0x90   :  { %v128_v9 = vsel %vm125_vm4, %v123_v63, %v268_v60  ;;  %v129_v10 = vsel %vm125_vm4, %v124_v0, %v269_v59 }
  0x92   :  { %v277_v1 = vpop.permute.xlu1 %276 }
  0x93   :  { %v272_v2 = vpop.permute.xlu0 %271  ;;  %v279_v3 = vunpack.i.h.bf16 %v277_v1  ;;  %v278_v4 = vunpack.i.l.bf16 %v277_v1 }
  0x94   :  { %v274_v5 = vunpack.i.h.bf16 %v272_v2  ;;  %v273_v6 = vunpack.i.l.bf16 %v272_v2 }
  0x95   :  { %v133_v13 = vsel %vm130_vm5, %v128_v9, %v278_v4  ;;  %v134_v14 = vsel %vm130_vm5, %v129_v10, %v279_v3 }
  0x96   :  { %v131_v11 = vsel %vm130_vm5, %v126_v7, %v273_v6  ;;  %v132_v12 = vsel %vm130_vm5, %v127_v8, %v274_v5  ;;  %v136_v16 = vpack.c.bf16 %v134_v14, %v133_v13 }
  0x97   :  { %v135_v15 = vpack.c.bf16 %v132_v12, %v131_v11 }
  0x98   :  { %227 = vmatmul.msk.bf16.vlgmr.msra.gmra.mxu1 %vm161_vm6, %v136_v16 }
  0x99   :  { %226 = vmatmul.msk.bf16.vlgmr.msra.gmra.mxu0 %vm161_vm6, %v135_v15 }
 0x115   :  { %v186_v19 = vpop.f32.mrf.mxu1 }
 0x116   :  { %v181_v18 = vpop.f32.mrf.mxu0  ;;  %v187_v21 = vadd.f32 %v280_v17, %v186_v19 }
 0x117   :  { %v182_v20 = vadd.f32 %v280_v17, %v181_v18 }
 0x118   :  { %v193_v23 = vmax.f32 %v187_v21, 0.0 }
 0x119   :  { %v191_v22 = vmax.f32 %v182_v20, 0.0 }
 0x11a   :  { %198 = vst.msk [vmem:[#allocation3 + $0x10] sm:$0xff] %vm195_vm7, %v193_v23 }
 0x11b   :  { %196 = vst.msk [vmem:[#allocation3] sm:$0xff] %vm195_vm7, %v191_v22 }
 0x11d   :  { %v188_v25 = vpop.f32.mrf.mxu1 }
 0x11e   :  { %v183_v24 = vpop.f32.mrf.mxu0  ;;  %v189_v27 = vadd.f32 %v280_v17, %v188_v25 }
 0x11f   :  { %v184_v26 = vadd.f32 %v280_v17, %v183_v24 }
 0x120   :  { %v194_v29 = vmax.f32 %v189_v27, 0.0 }
 0x121   :  { %v192_v28 = vmax.f32 %v184_v26, 0.0 }
 0x122   :  { %199 = vst.msk [vmem:[#allocation3 + $0x18] sm:$0xff] %vm195_vm7, %v194_v29 }
 0x123   :  { %197 = vst.msk [vmem:[#allocation3 + $0x8] sm:$0xff] %vm195_vm7, %v192_v28 }
 0x124   :  { %212 = dma.vmem_to_hbm [thread:$0]  %s205_s4, 512, %s207_s2, [#allocation4], %s313_s7, %s313_s7, %s309_s21  }
 0x125   :  { %305 = dma.done.wait [#allocation4], 512  }
 0x126   :  { %306 = vsyncadd [#allocation4], 4294966784 }
 0x127   :  { %217 = vsyncpa [#allocation4], 1 }

</bundles_post_ra>
